<compile_context>
chip_gen: v5e
topology: v5e:2x2
jax: 0.10.0
libtpu: 0.0.40
codegen_flags: <defaults>
</compile_context>

<pallas_src>
import jax
import jax.numpy as jnp
from jax.experimental import pallas as pl
from jax.experimental.pallas import tpu as pltpu

LANE = 128
SUBLANE = 8


def _round_up(x, m):
    return ((x + m - 1) // m) * m


def mlp_kernel(x_ref, w1_ref, b1_ref, w2_ref, b2_ref, w3_ref, b3_ref, o_ref):
    # x is (TB, in_features) bf16; weights bf16; biases f32; accumulate in f32.
    x = x_ref[...]
    h1 = jnp.dot(x, w1_ref[...], preferred_element_type=jnp.float32) + b1_ref[...]
    h1 = jnp.maximum(h1, 0.0).astype(jnp.bfloat16)          # ReLU, then bf16 MXU feed
    h2 = jnp.dot(h1, w2_ref[...], preferred_element_type=jnp.float32) + b2_ref[...]
    h2 = jnp.maximum(h2, 0.0).astype(jnp.bfloat16)          # ReLU, then bf16 MXU feed
    logits = jnp.dot(h2, w3_ref[...], preferred_element_type=jnp.float32) + b3_ref[...]
    o_ref[...] = logits.astype(o_ref.dtype)                 # lane-dense (TB, 128) store


def prepare_params(params):
    """One-time parameter prep (do this once, cache the result next to the params).

    * Casts weight matrices to bf16 (MXU feed).
    * Zero-pads W3/b3 to a lane-dense multiple-of-128 output slab.
    * Keeps biases in f32 (bias-add happens on the f32 accumulator).
    Returns (prepped_params, num_classes).
    """
    w1, b1, w2, b2, w3, b3 = params
    num_classes = w3.shape[1]
    n_pad = max(LANE, _round_up(num_classes, LANE))
    w3p = (jnp.zeros((w3.shape[0], n_pad), jnp.bfloat16)
           .at[:, :num_classes].set(w3.astype(jnp.bfloat16)))
    b3p = (jnp.zeros((1, n_pad), jnp.float32)
           .at[:, :num_classes].set(b3.astype(jnp.float32)))
    prepped = (w1.astype(jnp.bfloat16), b1.astype(jnp.float32),
               w2.astype(jnp.bfloat16), b2.astype(jnp.float32),
               w3p, b3p)
    return prepped, num_classes


def _pick_batch_tile(B, cap=512):
    """Batch tile: multiple of 8 sublanes, capped (cap=512 for v6e/v7x; use <=256
    on v5e).  When more than one grid step results, nudge the tile so the step
    count is even (v7x megacore balance)."""
    B8 = _round_up(B, SUBLANE)
    if B8 <= cap:
        return B8
    tb = cap
    n_steps = -(-B8 // tb)
    if n_steps % 2 == 1:
        tb = _round_up(-(-B8 // (n_steps + 1)), SUBLANE)
    return tb


def seizure_classifier_forward(x, prepped_params, num_classes, *, batch_tile=None):
    """x: (B, input_size) f32 (or bf16).  prepped_params: output of prepare_params."""
    w1, b1, w2, b2, w3p, b3p = prepped_params
    B, in_features = x.shape
    h1_dim, h2_dim = w1.shape[1], w2.shape[1]
    n_pad = w3p.shape[1]

    x = x.astype(jnp.bfloat16)  # halves the x DMA bytes into VMEM

    TB = batch_tile if batch_tile is not None else _pick_batch_tile(B)
    n_steps = -(-B // TB)
    B_pad = n_steps * TB
    if B_pad != B:  # only when B isn't already tile-aligned
        x = jnp.pad(x, ((0, B_pad - B), (0, 0)))

    batch_spec = lambda shape: pl.BlockSpec(shape, lambda i: (i, 0))   # tiled along batch
    resident = lambda shape: pl.BlockSpec(shape, lambda i: (0, 0))     # DMA'd once, VMEM-resident

    flops = 2 * B_pad * (in_features * h1_dim + h1_dim * h2_dim + h2_dim * n_pad)
    bytes_accessed = (
        2 * (B_pad * in_features + w1.size + w2.size + w3p.size)      # bf16 operands
        + 4 * (b1.size + b2.size + b3p.size + B_pad * n_pad)          # f32 biases + output
    )

    out = pl.pallas_call(
        mlp_kernel,
        out_shape=jax.ShapeDtypeStruct((B_pad, n_pad), jnp.float32),
        grid=(n_steps,),
        in_specs=[
            batch_spec((TB, in_features)),
            resident(w1.shape), resident(b1.shape),
            resident(w2.shape), resident(b2.shape),
            resident(w3p.shape), resident(b3p.shape),
        ],
        out_specs=batch_spec((TB, n_pad)),
        compiler_params=pltpu.CompilerParams(
            dimension_semantics=("parallel",)),
        cost_estimate=pl.CostEstimate(
            flops=flops, bytes_accessed=bytes_accessed, transcendentals=0),
    )(x, w1, b1, w2, b2, w3p, b3p)

    return out[:B, :num_classes]


def init_params(key, input_size, num_classes):
    """Deterministic init mimicking PyTorch nn.Linear default (U[-1/sqrt(fan_in), 1/sqrt(fan_in)])."""
    dims = [(input_size, 128), (128, 64), (64, num_classes)]
    params = []
    for i, (fan_in, fan_out) in enumerate(dims):
        kw, kb = jax.random.split(jax.random.fold_in(key, i))
        bound = 1.0 / jnp.sqrt(jnp.float32(fan_in))
        w = jax.random.uniform(kw, (fan_in, fan_out), jnp.float32, -bound, bound)
        b = jax.random.uniform(kb, (1, fan_out), jnp.float32, -bound, bound)
        params += [w, b]
    return tuple(params)


def reference_forward(x, params):
    w1, b1, w2, b2, w3, b3 = params
    h1 = jnp.maximum(x @ w1 + b1, 0.0)
    h2 = jnp.maximum(h1 @ w2 + b2, 0.0)
    return h2 @ w3 + b3


if __name__ == "__main__":
    key = jax.random.PRNGKey(0)
    batch, input_size, num_classes = 8, 32, 4

    x = jax.random.normal(jax.random.fold_in(key, 100), (batch, input_size), jnp.float32)
    raw_params = init_params(key, input_size, num_classes)

    # One-time prep (hoisted out of the forward path); cache `prepped` with the model.
    prepped, n_cls = prepare_params(raw_params)

    fwd = jax.jit(lambda xx: seizure_classifier_forward(xx, prepped, n_cls))
    out = jax.block_until_ready(fwd(x))

    ref = reference_forward(x, raw_params)  # f32 reference
    assert out.shape == (batch, num_classes)
    # bf16 MXU feed (f32 accumulate) -> relaxed tolerance vs. the f32 reference.
    assert jnp.allclose(out, ref, atol=5e-2, rtol=5e-2), float(jnp.max(jnp.abs(out - ref)))

    print("KERNEL_OK")
</pallas_src>

<mosaic_0001>
module attributes {stable_mosaic.version = 11 : i64} {
  func.func @mlp_kernel(%arg0: i32, %arg1: memref<8x32xbf16, #tpu.memory_space<vmem>>, %arg2: memref<32x128xbf16, #tpu.memory_space<vmem>>, %arg3: memref<1x128xf32, #tpu.memory_space<vmem>>, %arg4: memref<128x64xbf16, #tpu.memory_space<vmem>>, %arg5: memref<1x64xf32, #tpu.memory_space<vmem>>, %arg6: memref<64x128xbf16, #tpu.memory_space<vmem>>, %arg7: memref<1x128xf32, #tpu.memory_space<vmem>>, %arg8: memref<8x128xf32, #tpu.memory_space<vmem>>) attributes {dimension_semantics = [#tpu.dimension_semantics<parallel>], iteration_bounds = array<i64: 1>, scalar_prefetch = 0 : i64, scratch_operands = 0 : i64, tpu.core_type = #tpu.core_type<tc>, window_params = [{transform_indices = @transform_0, window_bounds = array<i64: 8, 32>}, {pipeline_mode = #tpu.pipeline_mode<synchronous>, transform_indices = @transform_1, window_bounds = array<i64: 32, 128>}, {pipeline_mode = #tpu.pipeline_mode<synchronous>, transform_indices = @transform_2, window_bounds = array<i64: 1, 128>}, {pipeline_mode = #tpu.pipeline_mode<synchronous>, transform_indices = @transform_3, window_bounds = array<i64: 128, 64>}, {pipeline_mode = #tpu.pipeline_mode<synchronous>, transform_indices = @transform_4, window_bounds = array<i64: 1, 64>}, {pipeline_mode = #tpu.pipeline_mode<synchronous>, transform_indices = @transform_5, window_bounds = array<i64: 64, 128>}, {pipeline_mode = #tpu.pipeline_mode<synchronous>, transform_indices = @transform_6, window_bounds = array<i64: 1, 128>}, {transform_indices = @transform_7, window_bounds = array<i64: 8, 128>}]} {
    %c0 = arith.constant 0 : index
    %c0_0 = arith.constant 0 : index
    %0 = vector.load %arg1[%c0, %c0_0] : memref<8x32xbf16, #tpu.memory_space<vmem>>, vector<8x32xbf16>
    %c0_1 = arith.constant 0 : index
    %c0_2 = arith.constant 0 : index
    %1 = vector.load %arg2[%c0_1, %c0_2] : memref<32x128xbf16, #tpu.memory_space<vmem>>, vector<32x128xbf16>
    %cst = arith.constant dense<0.000000e+00> : vector<8x128xf32>
    %2 = tpu.matmul %0, %1, %cst {dimension_numbers = #tpu.dot_dimension_numbers<[1], [0], [0], [1], [0, 0, 1, 1], [], []>} : vector<8x32xbf16>, vector<32x128xbf16>, vector<8x128xf32> -> vector<8x128xf32>
    %c0_3 = arith.constant 0 : index
    %c0_4 = arith.constant 0 : index
    %3 = vector.load %arg3[%c0_3, %c0_4] : memref<1x128xf32, #tpu.memory_space<vmem>>, vector<1x128xf32>
    %4 = vector.broadcast %3 : vector<1x128xf32> to vector<8x128xf32>
    %5 = arith.addf %2, %4 : vector<8x128xf32>
    %cst_5 = arith.constant 0.000000e+00 : f32
    %6 = vector.broadcast %cst_5 : f32 to vector<8x128xf32>
    %7 = arith.maximumf %5, %6 : vector<8x128xf32>
    %8 = arith.truncf %7 : vector<8x128xf32> to vector<8x128xbf16>
    %c0_6 = arith.constant 0 : index
    %c0_7 = arith.constant 0 : index
    %9 = vector.load %arg4[%c0_6, %c0_7] : memref<128x64xbf16, #tpu.memory_space<vmem>>, vector<128x64xbf16>
    %cst_8 = arith.constant dense<0.000000e+00> : vector<8x64xf32>
    %10 = tpu.matmul %8, %9, %cst_8 {dimension_numbers = #tpu.dot_dimension_numbers<[1], [0], [0], [1], [0, 0, 1, 1], [], []>} : vector<8x128xbf16>, vector<128x64xbf16>, vector<8x64xf32> -> vector<8x64xf32>
    %c0_9 = arith.constant 0 : index
    %c0_10 = arith.constant 0 : index
    %11 = vector.load %arg5[%c0_9, %c0_10] : memref<1x64xf32, #tpu.memory_space<vmem>>, vector<1x64xf32>
    %12 = vector.broadcast %11 : vector<1x64xf32> to vector<8x64xf32>
    %13 = arith.addf %10, %12 : vector<8x64xf32>
    %cst_11 = arith.constant 0.000000e+00 : f32
    %14 = vector.broadcast %cst_11 : f32 to vector<8x64xf32>
    %15 = arith.maximumf %13, %14 : vector<8x64xf32>
    %16 = arith.truncf %15 : vector<8x64xf32> to vector<8x64xbf16>
    %c0_12 = arith.constant 0 : index
    %c0_13 = arith.constant 0 : index
    %17 = vector.load %arg6[%c0_12, %c0_13] : memref<64x128xbf16, #tpu.memory_space<vmem>>, vector<64x128xbf16>
    %cst_14 = arith.constant dense<0.000000e+00> : vector<8x128xf32>
    %18 = tpu.matmul %16, %17, %cst_14 {dimension_numbers = #tpu.dot_dimension_numbers<[1], [0], [0], [1], [0, 0, 1, 1], [], []>} : vector<8x64xbf16>, vector<64x128xbf16>, vector<8x128xf32> -> vector<8x128xf32>
    %c0_15 = arith.constant 0 : index
    %c0_16 = arith.constant 0 : index
    %19 = vector.load %arg7[%c0_15, %c0_16] : memref<1x128xf32, #tpu.memory_space<vmem>>, vector<1x128xf32>
    %20 = vector.broadcast %19 : vector<1x128xf32> to vector<8x128xf32>
    %21 = arith.addf %18, %20 : vector<8x128xf32>
    %c0_17 = arith.constant 0 : index
    %c0_18 = arith.constant 0 : index
    %22 = vector.load %arg8[%c0_17, %c0_18] : memref<8x128xf32, #tpu.memory_space<vmem>>, vector<8x128xf32>
    tpu.vector_store %arg8[%c0_17, %c0_18], %21 {strides = array<i32>} : memref<8x128xf32, #tpu.memory_space<vmem>>, vector<8x128xf32>,
    return
  }
  func.func @transform_0(%arg0: i32) -> (i32, i32) {
    %c0_i32 = arith.constant 0 : i32
    %c0_i32_0 = arith.constant 0 : i32
    return %arg0, %c0_i32 : i32, i32
  }
  func.func @transform_1(%arg0: i32) -> (i32, i32) {
    %c0_i32 = arith.constant 0 : i32
    %c0_i32_0 = arith.constant 0 : i32
    %c0_i32_1 = arith.constant 0 : i32
    return %c0_i32, %c0_i32_0 : i32, i32
  }
  func.func @transform_2(%arg0: i32) -> (i32, i32) {
    %c0_i32 = arith.constant 0 : i32
    %c0_i32_0 = arith.constant 0 : i32
    %c0_i32_1 = arith.constant 0 : i32
    return %c0_i32, %c0_i32_0 : i32, i32
  }
  func.func @transform_3(%arg0: i32) -> (i32, i32) {
    %c0_i32 = arith.constant 0 : i32
    %c0_i32_0 = arith.constant 0 : i32
    %c0_i32_1 = arith.constant 0 : i32
    return %c0_i32, %c0_i32_0 : i32, i32
  }
  func.func @transform_4(%arg0: i32) -> (i32, i32) {
    %c0_i32 = arith.constant 0 : i32
    %c0_i32_0 = arith.constant 0 : i32
    %c0_i32_1 = arith.constant 0 : i32
    return %c0_i32, %c0_i32_0 : i32, i32
  }
  func.func @transform_5(%arg0: i32) -> (i32, i32) {
    %c0_i32 = arith.constant 0 : i32
    %c0_i32_0 = arith.constant 0 : i32
    %c0_i32_1 = arith.constant 0 : i32
    return %c0_i32, %c0_i32_0 : i32, i32
  }
  func.func @transform_6(%arg0: i32) -> (i32, i32) {
    %c0_i32 = arith.constant 0 : i32
    %c0_i32_0 = arith.constant 0 : i32
    %c0_i32_1 = arith.constant 0 : i32
    return %c0_i32, %c0_i32_0 : i32, i32
  }
  func.func @transform_7(%arg0: i32) -> (i32, i32) {
    %c0_i32 = arith.constant 0 : i32
    %c0_i32_0 = arith.constant 0 : i32
    return %arg0, %c0_i32 : i32, i32
  }
}

</mosaic_0001>

<bundles_post_ra>
// kernel: _lambda_.1
= control target key start
LH: loop header
LB: loop body
LE: loop exit
PB: predicated region body
PF: predicated region fallthrough
CT: control target
= control target key end

     0   :  { %12 = vsyncpa [#allocation3], 0  ;;  %s482_s0 = inlined_call_operand.vmem [shape: bf16[8,32], index: 0, kind: input, shape index: {}]   ;;  %s483_s1 = inlined_call_operand.hbm [shape: bf16[32,128], index: 1, kind: input, shape index: {}]   ;;  %s484_s2 = inlined_call_operand.vmem [shape: f32[1,128], index: 2, kind: input, shape index: {}]   ;;  %s485_s3 = inlined_call_operand.hbm [shape: bf16[128,64], index: 3, kind: input, shape index: {}]   ;;  %s486_s4 = inlined_call_operand.vmem [shape: f32[1,64], index: 4, kind: input, shape index: {}]   ;;  %s487_s5 = inlined_call_operand.hbm [shape: bf16[64,128], index: 5, kind: input, shape index: {}]   ;;  %s488_s6 = inlined_call_operand.vmem [shape: f32[1,128], index: 6, kind: input, shape index: {}]   ;;  %s489_s7 = inlined_call_operand.vmem [shape: f32[8,128], index: 7, kind: output, shape index: {}]  }
   0x1   :  { %13 = vsyncpa [#allocation5], 0  ;;  %s35_s26 = sshll.u32 %s485_s3, 4  ;;  %s413_s27 = smov [#allocation4]   ;;  %s36_s26 = int_to_ptr.hbm [resolvable:$true] %s35_s26 }
   0x2   :  { %s37_s28 = sshll.u32 %s413_s27, 4  ;;  %s20_s8 = sshll.u32 %s483_s1, 4  ;;  %s38_s28 = int_to_ptr.vmem [resolvable:$true] %s37_s28  ;;  %s21_s8 = int_to_ptr.hbm [resolvable:$true] %s20_s8 }
   0x3   :  { %s414_s9 = smov 64   ;;  %s415_s10 = smov 4  }
   0x4   :  { %43 = dma.hbm_to_vmem [thread:$0]  %s36_s26, 1024, %s38_s28, [#allocation5], %s414_s9, %s414_s9, %s415_s10  }
   0x5   :  { %s416_s11 = smov [#allocation2]   ;;  %s50_s15 = sshll.u32 %s487_s5, 4  ;;  %s51_s15 = int_to_ptr.hbm [resolvable:$true] %s50_s15 }
   0x6   :  { %s22_s12 = sshll.u32 %s416_s11, 4  ;;  %s417_s3 = smov [#allocation6]   ;;  %s23_s12 = int_to_ptr.vmem [resolvable:$true] %s22_s12 }
   0x7   :  { %28 = dma.hbm_to_vmem [thread:$0]  %s21_s8, 256, %s23_s12, [#allocation3], %s414_s9, %s414_s9, %s415_s10  }
   0x8   :  { %s52_s16 = sshll.u32 %s417_s3, 4  ;;  %s53_s16 = int_to_ptr.vmem [resolvable:$true] %s52_s16 }
   0x9   :  { %58 = dma.hbm_to_vmem [thread:$0]  %s51_s15, 512, %s53_s16, [#allocation5], %s414_s9, %s414_s9, %s415_s10  }
   0xa   :  { %409 = dma.done.wait [#allocation3], 256  }
   0xb   :  { %410 = vsyncadd [#allocation3], 4294967040 }
   0xc   :  { %411 = dma.done.wait [#allocation5], 1536  }
   0xd   :  { %412 = vsyncadd [#allocation5], 4294965760  ;;  %v316_v0 = vld [vmem:[#allocation2 + $0x8] sm:$0xff]  ;;  %v315_v2 = vld [vmem:[#allocation2] sm:$0xff]  ;;  %vm95_vm0 = vcmask 261120   ;;  %vm233_vm1 = vcmask 523264  }
   0xe   :  { %v324_v1 = vld [vmem:[#allocation4 + $0x38] sm:$0xff]  ;;  %105 = vmatpush.bf16.msra.mxu0 %v316_v0  ;;  %v323_v3 = vld [vmem:[#allocation4 + $0x30] sm:$0xff]  ;;  %v322_v5 = vld [vmem:[#allocation4 + $0x28] sm:$0xff] }
   0xf   :  { %182 = vmatpush.bf16.msra.mxu1 %v324_v1  ;;  %v74_v4 = vld [vmem:[%s482_s0] sm:$0xf]  ;;  %v321_v6 = vld [vmem:[#allocation4 + $0x20] sm:$0xff]  ;;  %v320_v7 = vld [vmem:[#allocation4 + $0x18] sm:$0xff] }
  0x10   :  { %v319_v8 = vld [vmem:[#allocation4 + $0x10] sm:$0xff]  ;;  %v318_v9 = vld [vmem:[#allocation4 + $0x8] sm:$0xff]  ;;  %v317_v10 = vld [vmem:[#allocation4] sm:$0xff] }
  0x11   :  { %v328_v11 = vld [vmem:[#allocation6 + $0x18] sm:$0xff]  ;;  %v327_v12 = vld [vmem:[#allocation6 + $0x10] sm:$0xff]  ;;  %v326_v19 = vld [vmem:[#allocation6 + $0x8] sm:$0xff] }
  0x12   :  { %106 = vmatpush.bf16.msra.mxu0 %v315_v2  ;;  %241 = vmatpush.bf16.msra.mxu2 %v328_v11  ;;  %v334_v13 = vld [vmem:[%s484_s2] ss:$0 sm:$0xff]  ;;  %v325_v20 = vld [vmem:[#allocation6] sm:$0xff] }
  0x13   :  { %183 = vmatpush.bf16.msra.mxu1 %v323_v3  ;;  %v335_v21 = vld [vmem:[%s486_s4] ss:$0 sm:$0xff] }
  0x14   :  { %v336_v27 = vld [vmem:[%s488_s6] ss:$0 sm:$0xff] }
  0x15   :  { %265 = vmatmul.msk.bf16.vlgmr.msra.gmra.mxu0 %vm95_vm0, %v74_v4 }
  0x16   :  { %242 = vmatpush.bf16.msra.mxu2 %v327_v12 }
  0x17   :  { %184 = vmatpush.bf16.msra.mxu1 %v322_v5 }
  0x1a   :  { %243 = vmatpush.bf16.msra.mxu2 %v326_v19 }
  0x1b   :  { %185 = vmatpush.bf16.msra.mxu1 %v321_v6 }
  0x1e   :  { %244 = vmatpush.bf16.msra.mxu2 %v325_v20 }
  0x1f   :  { %186 = vmatpush.bf16.msra.mxu1 %v320_v7 }
  0x23   :  { %187 = vmatpush.bf16.msra.mxu1 %v319_v8 }
  0x27   :  { %188 = vmatpush.bf16.msra.mxu1 %v318_v9 }
  0x2b   :  { %189 = vmatpush.bf16.msra.mxu1 %v317_v10 }
  0x92   :  { %v108_v14 = vpop.f32.mrf.mxu0 }
  0x93   :  { %v109_v15 = vadd.f32 %v334_v13, %v108_v14 }
  0x95   :  { %v112_v16 = vmax.f32 %v109_v15, 0.0 }
  0x97   :  { %v113_v17 = vpack.c.bf16 %v112_v16, %v112_v16 }
  0x99   :  { %190 = vmatmul.bf16.vlgmr.msra.gmra.mxu1 %v113_v17 }
  0x9a   :  { %v110_v18 = vpop.f32.mrf.mxu0 }
 0x116   :  { %v191_v22 = vpop.f32.mrf.mxu1 }
 0x117   :  { %v192_v23 = vadd.f32 %v335_v21, %v191_v22 }
 0x119   :  { %v195_v24 = vmax.f32 %v192_v23, 0.0 }
 0x11b   :  { %v196_v25 = vpack.c.bf16 %v195_v24, %v195_v24 }
 0x11d   :  { %314 = vmatmul.msk.bf16.vlgmr.msra.gmra.mxu2 %vm233_vm1, %v196_v25 }
 0x11e   :  { %v193_v26 = vpop.f32.mrf.mxu1 }
 0x1a0   :  { %v246_v28 = vpop.f32.mrf.mxu2 }
 0x1a1   :  { %v247_v29 = vadd.f32 %v336_v27, %v246_v28 }
 0x1a3   :  { %250 = vst [vmem:[%s489_s7] sm:$0xff] %v247_v29 }
 0x1a8   :  { %v248_v30 = vpop.f32.mrf.mxu2 }
 0x1a9   :  { %255 = vsyncpa [#allocation3], 1 }
 0x1aa   :  { %256 = vsyncpa [#allocation5], 1 }

</bundles_post_ra>
